<compile_context>
chip_gen: v5e
topology: v5e:2x2
jax: 0.10.0
libtpu: 0.0.40
codegen_flags: <defaults>
</compile_context>

<pallas_src>
import functools

import jax
import jax.numpy as jnp
from jax.experimental import pallas as pl
from jax.experimental.pallas import tpu as pltpu


_NEG_BIG = -9.0e15  # same masking constant as the PyTorch code


@functools.lru_cache(maxsize=1)
def _vmem_limit_bytes():
    """~3/4 of physical VMEM (96 MiB on v5e/v6e, 48 MiB on v7x)."""
    try:
        cap = pltpu.get_tpu_info().vmem_capacity_bytes
    except Exception:
        cap = 64 * 1024 * 1024
    return int(cap * 3 // 4)


def _row_tile(n):
    """q-row tile: full N for small graphs, else the largest divisor <= 512."""
    if n <= 512:
        return n
    for t in (512, 256, 128, 64, 32, 16, 8):
        if n % t == 0:
            return t
    return n


# ---------------------------------------------------------------------------
# Kernel 1: fused multi-head projection   Wh = h @ [W_0 | W_1 | ... | W_{H-1}]
# ---------------------------------------------------------------------------
def _project_kernel(h_ref, w_ref, o_ref):
    o_ref[...] = jnp.dot(h_ref[...], w_ref[...], preferred_element_type=jnp.float32)


def gat_project(h, w_packed):
    """h: (N, F_in), w_packed: (F_in, H*F_out) -> Wh (N, H*F_out) in concat layout."""
    n, f_in = h.shape
    hf = w_packed.shape[1]
    tn = _row_tile(n)
    return pl.pallas_call(
        _project_kernel,
        out_shape=jax.ShapeDtypeStruct((n, hf), jnp.float32),
        grid_spec=pltpu.PrefetchScalarGridSpec(
            num_scalar_prefetch=0,
            grid=(n // tn,),
            in_specs=[
                pl.BlockSpec((tn, f_in), lambda q: (q, 0)),
                pl.BlockSpec((f_in, hf), lambda q: (0, 0)),   # resident weights
            ],
            out_specs=pl.BlockSpec((tn, hf), lambda q: (q, 0)),
        ),
        compiler_params=pltpu.CompilerParams(
            dimension_semantics=("parallel",),
            vmem_limit_bytes=_vmem_limit_bytes(),
        ),
    )(h, w_packed)


# ---------------------------------------------------------------------------
# Kernel 2: masked attention softmax + aggregation (all heads) + fused epilogue
# ---------------------------------------------------------------------------
def _elu(x):
    return jnp.where(x > 0.0, x, jnp.exp(x) - 1.0)


def _leaky(x, slope):
    return jnp.where(x > 0.0, x, slope * x)


def _attn_heads(adj_ref, wh_ref, a1_ref, a2_ref, *, heads, f_out, alpha, tq):
    """Per-head h_prime = softmax(mask(e)) @ Wh_h for all heads of this q-tile."""
    mask = adj_ref[...] > 0                                 # (tq, N) from int8
    row0 = pl.multiple_of(pl.program_id(0) * tq, 8)
    wh_q = wh_ref[pl.ds(row0, tq), :]                       # (tq, H*F) query rows
    wh_all = wh_ref[...]                                    # (N, H*F) resident keys

    # attention-logit halves for all heads at once (tiny packed matmuls)
    f1_all = jnp.dot(wh_q, a1_ref[...],
                     preferred_element_type=jnp.float32)    # (tq, H)
    f2_all = jax.lax.dot_general(a2_ref[...], wh_all,
                                 (((1,), (1,)), ((), ())),
                                 preferred_element_type=jnp.float32)  # (H, N)

    outs = []
    for h in range(heads):
        e = f1_all[:, h:h + 1] + f2_all[h:h + 1, :]         # (tq, N); no (N,N,2F)
        e = jnp.where(e > 0.0, e, alpha * e)                # LeakyReLU(alpha)
        e = jnp.where(mask, e, _NEG_BIG)                    # adjacency mask
        e = e - jnp.max(e, axis=-1, keepdims=True)
        p = jnp.exp(e)
        denom = jnp.sum(p, axis=-1, keepdims=True)          # (tq, 1)
        acc = jnp.dot(p, wh_ref[:, h * f_out:(h + 1) * f_out],
                      preferred_element_type=jnp.float32)   # (tq, F_out)
        # fold softmax denominator once on the small result (EUP reciprocal)
        outs.append(acc * pl.reciprocal(denom, approx=True))
    return outs


def _attn_hidden_kernel(adj_ref, wh_ref, a1_ref, a2_ref, o_ref,
                        *, heads, f_out, alpha, tq):
    outs = _attn_heads(adj_ref, wh_ref, a1_ref, a2_ref,
                       heads=heads, f_out=f_out, alpha=alpha, tq=tq)
    hp = outs[0] if heads == 1 else jnp.concatenate(outs, axis=-1)
    o_ref[...] = _elu(hp)                                   # concat=True heads -> ELU


def _attn_final_kernel(adj_ref, wh_ref, a1_ref, a2_ref, bn_ref, o_ref,
                       *, heads, f_out, alpha, slope, tq):
    outs = _attn_heads(adj_ref, wh_ref, a1_ref, a2_ref,
                       heads=heads, f_out=f_out, alpha=alpha, tq=tq)
    hp = outs[0] if heads == 1 else jnp.concatenate(outs, axis=-1)
    y = _elu(hp)                                            # F.elu in GAT.forward
    y = y * bn_ref[0:1, :] + bn_ref[1:2, :]                 # eval BatchNorm1d (affine)
    o_ref[...] = _leaky(y, slope)                           # act1 = LeakyReLU(0.01)


def gat_attention(adj_mask, wh, a1_mat, a2_mat, *, heads, f_out, alpha,
                  bn_affine=None, act_slope=0.01):
    """adj_mask: (N, N) int8, wh: (N, H*F_out), a1_mat: (H*F_out, H), a2_mat: (H, H*F_out)."""
    # TODO(synk): for very large N (>~8k) add a key-axis grid dim with
    # flash-style online softmax so VMEM is O(tq*tk) instead of O(tq*N).
    n, hf = wh.shape
    assert hf == heads * f_out
    tq = _row_tile(n)
    in_specs = [
        pl.BlockSpec((tq, n), lambda q: (q, 0)),         # int8 adj rows of this q tile
        pl.BlockSpec((n, hf), lambda q: (0, 0)),         # Wh (all keys) resident
        pl.BlockSpec((hf, heads), lambda q: (0, 0)),     # packed a1 (query halves)
        pl.BlockSpec((heads, hf), lambda q: (0, 0)),     # packed a2 (key halves)
    ]
    if bn_affine is None:
        kernel = functools.partial(_attn_hidden_kernel,
                                   heads=heads, f_out=f_out, alpha=alpha, tq=tq)
        args = (adj_mask, wh, a1_mat, a2_mat)
    else:
        kernel = functools.partial(_attn_final_kernel, heads=heads, f_out=f_out,
                                   alpha=alpha, slope=act_slope, tq=tq)
        in_specs = in_specs + [pl.BlockSpec((2, hf), lambda q: (0, 0))]
        args = (adj_mask, wh, a1_mat, a2_mat, bn_affine)
    return pl.pallas_call(
        kernel,
        out_shape=jax.ShapeDtypeStruct((n, hf), jnp.float32),
        grid_spec=pltpu.PrefetchScalarGridSpec(
            num_scalar_prefetch=0,
            grid=(n // tq,),
            in_specs=in_specs,
            out_specs=pl.BlockSpec((tq, hf), lambda q: (q, 0)),
        ),
        compiler_params=pltpu.CompilerParams(
            dimension_semantics=("parallel",),
            vmem_limit_bytes=_vmem_limit_bytes(),
        ),
    )(*args)


# ---------------------------------------------------------------------------
# Full GAT forward (inference)
# ---------------------------------------------------------------------------
def gat_forward(x, adj, params, *, alpha=0.2, act_slope=0.01):
    """x: (N, nfeat), adj: (N, N). Returns (N, nout)."""
    # TODO(synk): dropout layers are identity (inference); training-mode dropout
    # and training-mode BatchNorm batch statistics are not implemented.
    n = x.shape[0]
    heads, f_in, nhid = params["W1"].shape
    nout = params["W2"].shape[-1]

    # pad rows to a multiple of 8; padded keys are masked out by zero adj cols
    np8 = -(-n // 8) * 8
    if np8 != n:
        x = jnp.pad(x, ((0, np8 - n), (0, 0)))
        adj = jnp.pad(adj, ((0, np8 - n), (0, np8 - n)))
    adj_mask = (adj > 0).astype(jnp.int8)            # 4x less HBM traffic than f32

    # ---- layer 1: multi-head hidden layer, heads fused ----
    w1_packed = jnp.transpose(params["W1"], (1, 0, 2)).reshape(f_in, heads * nhid)
    eye = jnp.eye(heads, dtype=jnp.float32)
    a1_1 = params["a1"][:, :nhid]                    # (H, nhid) query halves
    a2_1 = params["a1"][:, nhid:]                    # (H, nhid) key halves
    a1_mat1 = jnp.einsum("hf,hk->hfk", a1_1, eye).reshape(heads * nhid, heads)
    a2_mat1 = jnp.einsum("hf,hk->khf", a2_1, eye).reshape(heads, heads * nhid)

    wh1 = gat_project(x, w1_packed)                  # (Np, H*nhid), concat layout
    h_cat = gat_attention(adj_mask, wh1, a1_mat1, a2_mat1,
                          heads=heads, f_out=nhid, alpha=alpha)   # (Np, H*nhid)

    # ---- layer 2: out_att (concat=False) + ELU + eval-BN affine + LeakyReLU ----
    scale = params["bn_gamma"] * jax.lax.rsqrt(params["bn_var"] + 1e-5)
    shift = params["bn_beta"] - params["bn_mean"] * scale
    bn_affine = jnp.stack([scale, shift]).astype(jnp.float32)     # (2, nout)

    a1_mat2 = params["a2"][:, :nout].T               # (nout, 1)
    a2_mat2 = params["a2"][:, nout:]                 # (1, nout)

    wh2 = gat_project(h_cat, params["W2"])           # (Np, nout)
    out = gat_attention(adj_mask, wh2, a1_mat2, a2_mat2,
                        heads=1, f_out=nout, alpha=alpha,
                        bn_affine=bn_affine, act_slope=act_slope)  # (Np, nout)
    return out[:n]


# ---------------------------------------------------------------------------
# Pure-JAX reference mirroring the PyTorch forward (eval mode)
# ---------------------------------------------------------------------------
def reference(x, adj, params, *, alpha=0.2, act_slope=0.01):
    def layer(h, w, a_vec, concat):
        wh = h @ w
        fo = w.shape[1]
        f1 = wh @ a_vec[:fo][:, None]
        f2 = wh @ a_vec[fo:][:, None]
        e = f1 + f2.T
        e = jnp.where(e > 0.0, e, alpha * e)
        e = jnp.where(adj > 0.0, e, _NEG_BIG)
        att = jax.nn.softmax(e, axis=1)
        hp = att @ wh
        return jnp.where(hp > 0.0, hp, jnp.exp(hp) - 1.0) if concat else hp

    heads = params["W1"].shape[0]
    h_cat = jnp.concatenate(
        [layer(x, params["W1"][i], params["a1"][i], True) for i in range(heads)],
        axis=1)
    out = layer(h_cat, params["W2"], params["a2"][0], False)
    out = jnp.where(out > 0.0, out, jnp.exp(out) - 1.0)            # F.elu
    out = (out - params["bn_mean"]) * jax.lax.rsqrt(params["bn_var"] + 1e-5)
    out = out * params["bn_gamma"] + params["bn_beta"]
    return jnp.where(out > 0.0, out, act_slope * out)              # LeakyReLU(0.01)


if __name__ == "__main__":
    N, nfeat, nhid, nout, nheads = 24, 32, 16, 8, 4
    alpha = 0.2
    key = jax.random.PRNGKey(0)
    ks = jax.random.split(key, 8)

    x = jax.random.normal(ks[0], (N, nfeat), jnp.float32)
    adj = (jax.random.uniform(ks[1], (N, N)) > 0.5).astype(jnp.float32)
    adj = jnp.maximum(adj, jnp.eye(N, dtype=jnp.float32))          # self loops

    params = {
        "W1": 0.3 * jax.random.normal(ks[2], (nheads, nfeat, nhid), jnp.float32),
        "a1": 0.3 * jax.random.normal(ks[3], (nheads, 2 * nhid), jnp.float32),
        "W2": 0.3 * jax.random.normal(ks[4], (nheads * nhid, nout), jnp.float32),
        "a2": 0.3 * jax.random.normal(ks[5], (1, 2 * nout), jnp.float32),
        # eval-mode BatchNorm1d(nout) parameters / running stats
        "bn_gamma": jnp.ones((nout,), jnp.float32),
        "bn_beta": jnp.zeros((nout,), jnp.float32),
        "bn_mean": 0.1 * jax.random.normal(ks[6], (nout,), jnp.float32),
        "bn_var": jnp.abs(jax.random.normal(ks[7], (nout,), jnp.float32)) + 0.5,
    }

    out = jax.block_until_ready(gat_forward(x, adj, params, alpha=alpha))
    ref = reference(x, adj, params, alpha=alpha)
    assert out.shape == (N, nout)
    # approx=True (EUP) reciprocal in the softmax normalization -> allow ~1e-3 error
    assert jnp.allclose(out, ref, atol=2e-3, rtol=2e-3), "mismatch vs reference"
    print("KERNEL_OK")
</pallas_src>

<mosaic_0001>
module attributes {stable_mosaic.version = 11 : i64} {
  func.func @_project_kernel(%arg0: i32, %arg1: memref<24x32xf32, #tpu.memory_space<vmem>>, %arg2: memref<32x64xf32, #tpu.memory_space<vmem>>, %arg3: memref<24x64xf32, #tpu.memory_space<vmem>>) attributes {dimension_semantics = [#tpu.dimension_semantics<parallel>], iteration_bounds = array<i64: 1>, scalar_prefetch = 0 : i64, scratch_operands = 0 : i64, tpu.core_type = #tpu.core_type<tc>, window_params = [{transform_indices = @transform_0, window_bounds = array<i64: 24, 32>}, {pipeline_mode = #tpu.pipeline_mode<synchronous>, transform_indices = @transform_1, window_bounds = array<i64: 32, 64>}, {transform_indices = @transform_2, window_bounds = array<i64: 24, 64>}]} {
    %c0 = arith.constant 0 : index
    %c0_0 = arith.constant 0 : index
    %0 = vector.load %arg1[%c0, %c0_0] : memref<24x32xf32, #tpu.memory_space<vmem>>, vector<24x32xf32>
    %c0_1 = arith.constant 0 : index
    %c0_2 = arith.constant 0 : index
    %1 = vector.load %arg2[%c0_1, %c0_2] : memref<32x64xf32, #tpu.memory_space<vmem>>, vector<32x64xf32>
    %cst = arith.constant dense<0.000000e+00> : vector<24x64xf32>
    %2 = tpu.matmul %0, %1, %cst {dimension_numbers = #tpu.dot_dimension_numbers<[1], [0], [0], [1], [0, 0, 1, 1], [], []>} : vector<24x32xf32>, vector<32x64xf32>, vector<24x64xf32> -> vector<24x64xf32>
    %c0_3 = arith.constant 0 : index
    %c0_4 = arith.constant 0 : index
    %3 = vector.load %arg3[%c0_3, %c0_4] : memref<24x64xf32, #tpu.memory_space<vmem>>, vector<24x64xf32>
    tpu.vector_store %arg3[%c0_3, %c0_4], %2 {strides = array<i32>} : memref<24x64xf32, #tpu.memory_space<vmem>>, vector<24x64xf32>,
    return
  }
  func.func @transform_0(%arg0: i32) -> (i32, i32) {
    %c0_i32 = arith.constant 0 : i32
    %c0_i32_0 = arith.constant 0 : i32
    return %arg0, %c0_i32 : i32, i32
  }
  func.func @transform_1(%arg0: i32) -> (i32, i32) {
    %c0_i32 = arith.constant 0 : i32
    %c0_i32_0 = arith.constant 0 : i32
    %c0_i32_1 = arith.constant 0 : i32
    return %c0_i32, %c0_i32_0 : i32, i32
  }
  func.func @transform_2(%arg0: i32) -> (i32, i32) {
    %c0_i32 = arith.constant 0 : i32
    %c0_i32_0 = arith.constant 0 : i32
    return %arg0, %c0_i32 : i32, i32
  }
}

</mosaic_0001>

<bundles_post_ra>
// kernel: tpu_custom_call.1
= control target key start
LH: loop header
LB: loop body
LE: loop exit
PB: predicated region body
PF: predicated region fallthrough
CT: control target
= control target key end

     0   :  { %7 = vsyncpa [#allocation3], 0  ;;  %s243_s0 = inlined_call_operand.hbm [shape: f32[24,32], index: 0, kind: input, shape index: {}]   ;;  %s244_s1 = inlined_call_operand.hbm [shape: f32[32,64], index: 1, kind: input, shape index: {}]   ;;  %s245_s2 = inlined_call_operand.hbm [shape: f32[24,64], index: 2, kind: output, shape index: {}]  }
   0x1   :  { %8 = vsyncpa [#allocation6], 0 }
   0x2   :  { %9 = vsyncpa [#allocation4], 0  ;;  %s14_s11 = sshll.u32 %s243_s0, 4  ;;  %s205_s12 = smov [#allocation2]   ;;  %s15_s11 = int_to_ptr.hbm [resolvable:$true] %s14_s11 }
   0x3   :  { %s16_s13 = sshll.u32 %s205_s12, 4  ;;  %s27_s16 = sshll.u32 %s244_s1, 4  ;;  %s17_s13 = int_to_ptr.vmem [resolvable:$true] %s16_s13  ;;  %s28_s16 = int_to_ptr.hbm [resolvable:$true] %s27_s16 }
   0x4   :  { %s206_s17 = smov 128   ;;  %s207_s18 = smov 8  }
   0x5   :  { %22 = dma.hbm_to_vmem [thread:$0]  %s15_s11, 384, %s17_s13, [#allocation3], %s206_s17, %s206_s17, %s207_s18  }
   0x6   :  { %s208_s19 = smov [#allocation5]  }
   0x7   :  { %s29_s20 = sshll.u32 %s208_s19, 4  ;;  %s30_s20 = int_to_ptr.vmem [resolvable:$true] %s29_s20 }
   0x8   :  { %35 = dma.hbm_to_vmem [thread:$0]  %s28_s16, 512, %s30_s20, [#allocation6], %s206_s17, %s206_s17, %s207_s18  }
   0x9   :  { %199 = dma.done.wait [#allocation3], 384  }
   0xa   :  { %200 = vsyncadd [#allocation3], 4294966912 }
   0xb   :  { %201 = dma.done.wait [#allocation6], 512  }
   0xc   :  { %202 = vsyncadd [#allocation6], 4294966784  ;;  %v50_v0 = vld [vmem:[#allocation5 + $0x18] sm:$0xff]  ;;  %v49_v1 = vld [vmem:[#allocation5 + $0x10] sm:$0xff]  ;;  %vm51_vm0 = vcmask 261120   ;;  %vm87_vm1 = vcmask 523264  }
   0xd   :  { %115 = vmatpush.msra.mxu2 %v50_v0  ;;  %73 = vmatpush.msra.mxu0 %v50_v0  ;;  %v48_v2 = vld [vmem:[#allocation5 + $0x8] sm:$0xff]  ;;  %v47_v3 = vld [vmem:[#allocation5] sm:$0xff]  ;;  %v46_v4 = vld [vmem:[#allocation2 + $0x10] sm:$0xff]  ;;  %s209_s0 = smov [#allocation7]   ;;  %s97_s23 = sshll.u32 %s245_s2, 4  ;;  %s98_s23 = int_to_ptr.hbm [resolvable:$true] %s97_s23 }
   0xe   :  { %114 = vmatpush.msra.mxu1 %v50_v0  ;;  %v44_v5 = vld [vmem:[#allocation2] sm:$0xff]  ;;  %v45_v6 = vld [vmem:[#allocation2 + $0x8] sm:$0xff]  ;;  %s95_s1 = sshll.u32 %s209_s0, 4  ;;  %s96_s1 = int_to_ptr.vmem [resolvable:$true] %s95_s1 }
   0xf   :  { %117 = vmatpush.msra.mxu2 %v49_v1  ;;  %74 = vmatpush.msra.mxu0 %v49_v1 }
  0x10   :  { %116 = vmatpush.msra.mxu1 %v49_v1 }
  0x11   :  { %119 = vmatpush.msra.mxu2 %v48_v2  ;;  %75 = vmatpush.msra.mxu0 %v48_v2 }
  0x12   :  { %118 = vmatpush.msra.mxu1 %v48_v2 }
  0x13   :  { %121 = vmatpush.msra.mxu2 %v47_v3  ;;  %76 = vmatpush.msra.mxu0 %v47_v3 }
  0x14   :  { %113 = vmatmul.msk.f32.vlgmr.msra.gmra.mxu2 %vm51_vm0, %v46_v4  ;;  %120 = vmatpush.msra.mxu1 %v47_v3 }
  0x15   :  { %111 = vmatmul.msk.f32.vlgmr.msra.gmra.mxu0 %vm51_vm0, %v44_v5  ;;  %112 = vmatmul.msk.f32.vlgmr.msra.gmra.mxu1 %vm51_vm0, %v45_v6 }
  0x92   :  { %v78_v7 = vpop.f32.mrf.mxu0  ;;  %v81_v8 = vpop.f32.mrf.mxu1 }
  0x93   :  { %88 = vst.msk [vmem:[#allocation7] sm:$0xff] %vm87_vm1, %v78_v7 }
  0x94   :  { %89 = vst.msk [vmem:[#allocation7 + $0x8] sm:$0xff] %vm87_vm1, %v81_v8 }
  0x97   :  { %v84_v9 = vpop.f32.mrf.mxu2 }
  0x98   :  { %90 = vst.msk [vmem:[#allocation7 + $0x10] sm:$0xff] %vm87_vm1, %v84_v9 }
  0x99   :  { %103 = dma.vmem_to_hbm [thread:$0]  %s96_s1, 384, %s98_s23, [#allocation4], %s206_s17, %s206_s17, %s207_s18  }
  0x9a   :  { %203 = dma.done.wait [#allocation4], 384  }
  0x9b   :  { %204 = vsyncadd [#allocation4], 4294966912 }
  0x9c   :  { %108 = vsyncpa [#allocation3], 1 }
  0x9d   :  { %109 = vsyncpa [#allocation6], 1 }
  0x9e   :  { %110 = vsyncpa [#allocation4], 1 }

</bundles_post_ra>
